<compile_context>
chip_gen: v7x
topology: tpu7x:2x2x1
jax: 0.10.0
libtpu: 0.0.40
codegen_flags: <defaults>
</compile_context>

<pallas_src>
import math

import jax
import jax.numpy as jnp
from jax.experimental import pallas as pl
from jax.experimental.pallas import tpu as pltpu


def _matmul(w, x):
    """(O, K) @ (K, N) -> (O, N), f32 accumulation on the MXU.

    Activations are cast to the weight dtype: bf16 weights give a native bf16
    MXU pass; f32 weights keep full-precision f32 passes (matches nn.Conv1d).
    """
    return jnp.dot(w, x.astype(w.dtype), preferred_element_type=jnp.float32)


def _mlp_kernel(x_ref, w1_ref, b1_ref, wd_ref, bd_ref, w2_ref, b2_ref,
                nstart_ref, nend_ref, o_ref):
    x = x_ref[...]                                        # (Cin, TN), TN = Bb*L

    # fc1: pointwise conv == matmul.
    h = _matmul(w1_ref[...], x) + b1_ref[...]             # (H, TN) f32

    tn = h.shape[1]

    # DDConv: depthwise conv1d, kernel=3, padding=1, groups=H.
    # +-1 shifts via XLU roll (free slot); the (1, TN) "not sample start" /
    # "not sample end" masks zero the cyclic cross-sample neighbors (== the
    # zero padding of the conv) with a single broadcast multiply each.
    left = pltpu.roll(h, shift=1, axis=1) * nstart_ref[...]       # h[:, c-1]
    right = pltpu.roll(h, shift=tn - 1, axis=1) * nend_ref[...]   # h[:, c+1]
    y = (wd_ref[:, 0:1] * left
         + wd_ref[:, 1:2] * h
         + wd_ref[:, 2:3] * right
         + bd_ref[...])                                   # (H, TN)

    # GELU -- exact erf form to match nn.GELU() default semantics.
    # TODO(synk): jax.nn.gelu(y, approximate=True) would move this to the EUP
    # (tanh) and relieve the VALU; needs a numerics sign-off vs exact erf.
    y = 0.5 * y * (1.0 + jax.lax.erf(y * (1.0 / math.sqrt(2.0))))

    # fc2: pointwise conv == matmul.
    o_ref[...] = (_matmul(w2_ref[...], y) + b2_ref[...]).astype(o_ref.dtype)


def _vmem_capacity_bytes():
    try:
        cap = getattr(pltpu.get_tpu_info(), "vmem_capacity_bytes", None)
        if cap:
            return int(cap)
    except Exception:
        pass
    return 64 * 1024 * 1024  # conservative (v7x per-TC VMEM)


def _choose_tiling(batch, seq_len, c_in, hidden, c_out, vmem_budget_bytes):
    """Return (bb, padded_batch): samples per lane tile and padded batch.

    Invariants: padded_batch % bb == 0, and either bb == padded_batch == batch
    (single full-array tile) or bb*seq_len is a multiple of 128 (lane-aligned
    multi-tile grid).  Tiles always align to sample boundaries, so the
    depthwise conv never needs a cross-tile halo.
    """
    lane_mult = 128 // math.gcd(seq_len, 128)   # samples per 128-lane unit

    # f32 working set per lane column: double-buffered x/out blocks plus ~6
    # hidden-sized temporaries (h, left, right, y, gelu, casts).
    bytes_per_col = 4 * (2 * c_in + 2 * c_out + 6 * hidden)
    budget_bb = max(1, vmem_budget_bytes // (bytes_per_col * seq_len))

    # Candidate tile from the VMEM budget, aligned so bb*L % 128 == 0.
    bb = max(lane_mult, (budget_bb // lane_mult) * lane_mult)

    # v7x megacore: prefer >= 2 grid steps (both TensorCores) whenever each
    # tile still keeps >= 512 lanes (HBM roofline / 0.35us per-step overhead
    # stay amortized).  Harmless on single-TensorCore v5e/v6e.
    half = (batch // (2 * lane_mult)) * lane_mult
    if half >= lane_mult and half * seq_len >= 512:
        bb = min(bb, half)

    if bb >= batch:
        return batch, batch                     # one full-array tile
    padded_batch = -(-batch // bb) * bb         # pad batch; extra rows discarded
    return bb, padded_batch


def mlp_forward(x, w1, b1, wd, bd, w2, b2, *, matmul_dtype=None):
    """x: (B, Cin, L); w1: (H, Cin); b1: (H, 1); wd: (H, 3); bd: (H, 1);
    w2: (Cout, H); b2: (Cout, 1).  Returns (B, Cout, L).

    matmul_dtype: optional dtype (e.g. jnp.bfloat16) for the two 1x1-conv
    matmuls (f32 accumulation).  Default None keeps the weight dtype exactly.
    """
    batch, c_in, seq_len = x.shape
    hidden = w1.shape[0]
    c_out = w2.shape[0]

    if matmul_dtype is not None:
        w1 = w1.astype(matmul_dtype)
        w2 = w2.astype(matmul_dtype)

    # Generation-aware VMEM budgeting (v5e/v6e: 128 MiB, v7x: 64 MiB).
    cap = _vmem_capacity_bytes()
    vmem_limit = int(min(int(cap * 0.75), 100 * 1024 * 1024))
    fixed_bytes = 4 * (hidden * c_in + 5 * hidden + c_out * hidden + c_out)
    tile_budget = max(4 * 1024 * 1024, cap // 4 - 2 * fixed_bytes)

    bb, padded_batch = _choose_tiling(batch, seq_len, c_in, hidden, c_out,
                                      tile_budget)
    if padded_batch != batch:
        x = jnp.pad(x, ((0, padded_batch - batch), (0, 0), (0, 0)))

    # Fold batch into the lane axis: (B, Cin, L) -> (Cin, B*L).  Stores become
    # lane-dense and each 1x1 conv is a single (O, K) @ (K, TN) matmul.
    # TODO(synk): if adjacent layers run in this folded layout too, keep
    # activations as (C, B*L) end-to-end so XLA's transpose round trips vanish.
    # TODO(synk): for Cin/Cout < 8 the (8,128) HBM tiles of x/out are >=50%
    # sublane padding; padding channels to 8 upstream would halve that traffic.
    total = padded_batch * seq_len
    x2 = jnp.transpose(x, (1, 0, 2)).reshape(c_in, total)

    tn = bb * seq_len
    grid = (total // tn,)   # exact by construction

    # Depthwise boundary masks, identical for every tile (TN is a multiple of
    # L): 0.0 at sample starts / ends, 1.0 elsewhere.
    pos = jnp.arange(tn, dtype=jnp.int32) % seq_len
    not_start = (pos != 0).astype(jnp.float32)[None, :]
    not_end = (pos != seq_len - 1).astype(jnp.float32)[None, :]

    def run(single_buffer_weights):
        if single_buffer_weights:
            def const_spec(shape):
                return pl.BlockSpec(shape, lambda g: (0, 0),
                                    pipeline_mode=pl.Buffered(1))
        else:
            def const_spec(shape):
                return pl.BlockSpec(shape, lambda g: (0, 0))
        return pl.pallas_call(
            _mlp_kernel,
            out_shape=jax.ShapeDtypeStruct((c_out, total), x.dtype),
            grid_spec=pltpu.PrefetchScalarGridSpec(
                num_scalar_prefetch=0,
                grid=grid,
                in_specs=[
                    pl.BlockSpec((c_in, tn), lambda g: (0, g)),
                    # Constant-index weight/bias blocks (never re-fetched).
                    const_spec((hidden, c_in)),
                    const_spec((hidden, 1)),
                    const_spec((hidden, 3)),
                    const_spec((hidden, 1)),
                    const_spec((c_out, hidden)),
                    const_spec((c_out, 1)),
                    # Boundary masks (constant across grid steps).
                    const_spec((1, tn)),
                    const_spec((1, tn)),
                ],
                out_specs=pl.BlockSpec((c_out, tn), lambda g: (0, g)),
            ),
            compiler_params=pltpu.CompilerParams(
                dimension_semantics=("parallel",),
                vmem_limit_bytes=vmem_limit,
            ),
        )(x2, w1, b1, wd, bd, w2, b2, not_start, not_end)

    try:
        out2 = run(True)          # single-buffered constant weight blocks
    except Exception:
        out2 = run(False)         # fallback: default double buffering

    out = jnp.transpose(out2.reshape(c_out, padded_batch, seq_len), (1, 0, 2))
    return out[:batch] if padded_batch != batch else out


def _reference(x, w1, b1, wd, bd, w2, b2):
    """Pure-JAX f32 reference (explicit math, HIGHEST precision matmuls)."""
    hi = jax.lax.Precision.HIGHEST
    h = jnp.einsum("oc,bcl->bol", w1, x, precision=hi) + b1[None]
    hp = jnp.pad(h, ((0, 0), (0, 0), (1, 1)))
    hd = (wd[None, :, 0:1] * hp[:, :, :-2]
          + wd[None, :, 1:2] * hp[:, :, 1:-1]
          + wd[None, :, 2:3] * hp[:, :, 2:]
          + bd[None])
    g = 0.5 * hd * (1.0 + jax.lax.erf(hd / math.sqrt(2.0)))
    return jnp.einsum("oc,bcl->bol", w2, g, precision=hi) + b2[None]


if __name__ == "__main__":
    # Small shapes consistent with the module (Conv1d input is (B, C, L)).
    B, Cin, L = 2, 4, 16
    Hid = 8
    Cout = Cin  # out_features defaults to in_features

    key = jax.random.PRNGKey(0)
    k_x, k1, kd, k2 = jax.random.split(key, 4)

    x = jax.random.normal(k_x, (B, Cin, L), dtype=jnp.float32)

    # Deterministic init mimicking Mlp._init_weights for Conv1d:
    #   weight ~ N(0, sqrt(2 / fan_out)), fan_out = k * out_ch / groups; bias 0.
    w1 = jax.random.normal(k1, (Hid, Cin), jnp.float32) * math.sqrt(2.0 / (1 * Hid))
    b1 = jnp.zeros((Hid, 1), jnp.float32)
    wd = jax.random.normal(kd, (Hid, 3), jnp.float32) * math.sqrt(2.0 / 3.0)
    bd = jnp.zeros((Hid, 1), jnp.float32)
    w2 = jax.random.normal(k2, (Cout, Hid), jnp.float32) * math.sqrt(2.0 / (1 * Cout))
    b2 = jnp.zeros((Cout, 1), jnp.float32)

    out = mlp_forward(x, w1, b1, wd, bd, w2, b2)
    out = jax.block_until_ready(out)

    ref = _reference(x, w1, b1, wd, bd, w2, b2)
    assert out.shape == (B, Cout, L)
    assert jnp.allclose(out, ref, atol=1e-4, rtol=1e-4), "mismatch vs reference"

    print("KERNEL_OK")
</pallas_src>

<mosaic_0001>
module attributes {stable_mosaic.version = 11 : i64} {
  func.func @_mlp_kernel(%arg0: i32, %arg1: memref<4x32xf32, #tpu.memory_space<vmem>>, %arg2: memref<8x4xf32, #tpu.memory_space<vmem>>, %arg3: memref<8x1xf32, #tpu.memory_space<vmem>>, %arg4: memref<8x3xf32, #tpu.memory_space<vmem>>, %arg5: memref<8x1xf32, #tpu.memory_space<vmem>>, %arg6: memref<4x8xf32, #tpu.memory_space<vmem>>, %arg7: memref<4x1xf32, #tpu.memory_space<vmem>>, %arg8: memref<1x32xf32, #tpu.memory_space<vmem>>, %arg9: memref<1x32xf32, #tpu.memory_space<vmem>>, %arg10: memref<4x32xf32, #tpu.memory_space<vmem>>) attributes {dimension_semantics = [#tpu.dimension_semantics<parallel>], iteration_bounds = array<i64: 1>, scalar_prefetch = 0 : i64, scratch_operands = 0 : i64, tpu.core_type = #tpu.core_type<tc>, window_params = [{transform_indices = @transform_0, window_bounds = array<i64: 4, 32>}, {pipeline_mode = #tpu.pipeline_mode<synchronous>, transform_indices = @transform_1, window_bounds = array<i64: 8, 4>}, {pipeline_mode = #tpu.pipeline_mode<synchronous>, transform_indices = @transform_2, window_bounds = array<i64: 8, 1>}, {pipeline_mode = #tpu.pipeline_mode<synchronous>, transform_indices = @transform_3, window_bounds = array<i64: 8, 3>}, {pipeline_mode = #tpu.pipeline_mode<synchronous>, transform_indices = @transform_4, window_bounds = array<i64: 8, 1>}, {pipeline_mode = #tpu.pipeline_mode<synchronous>, transform_indices = @transform_5, window_bounds = array<i64: 4, 8>}, {pipeline_mode = #tpu.pipeline_mode<synchronous>, transform_indices = @transform_6, window_bounds = array<i64: 4, 1>}, {pipeline_mode = #tpu.pipeline_mode<synchronous>, transform_indices = @transform_7, window_bounds = array<i64: 1, 32>}, {pipeline_mode = #tpu.pipeline_mode<synchronous>, transform_indices = @transform_8, window_bounds = array<i64: 1, 32>}, {transform_indices = @transform_9, window_bounds = array<i64: 4, 32>}]} {
    %c0 = arith.constant 0 : index
    %c0_0 = arith.constant 0 : index
    %0 = vector.load %arg1[%c0, %c0_0] : memref<4x32xf32, #tpu.memory_space<vmem>>, vector<4x32xf32>
    %c0_1 = arith.constant 0 : index
    %c0_2 = arith.constant 0 : index
    %1 = vector.load %arg2[%c0_1, %c0_2] : memref<8x4xf32, #tpu.memory_space<vmem>>, vector<8x4xf32>
    %cst = arith.constant dense<0.000000e+00> : vector<8x32xf32>
    %2 = tpu.matmul %1, %0, %cst {dimension_numbers = #tpu.dot_dimension_numbers<[1], [0], [0], [1], [0, 0, 1, 1], [], []>} : vector<8x4xf32>, vector<4x32xf32>, vector<8x32xf32> -> vector<8x32xf32>
    %c0_3 = arith.constant 0 : index
    %c0_4 = arith.constant 0 : index
    %3 = vector.load %arg3[%c0_3, %c0_4] : memref<8x1xf32, #tpu.memory_space<vmem>>, vector<8x1xf32>
    %4 = vector.broadcast %3 : vector<8x1xf32> to vector<8x32xf32>
    %5 = arith.addf %2, %4 : vector<8x32xf32>
    %c1_i32 = arith.constant 1 : i32
    %6 = tpu.dynamic_rotate %5 by %c1_i32 dim 1 : vector<8x32xf32>, i32 -> vector<8x32xf32>
    %c0_5 = arith.constant 0 : index
    %c0_6 = arith.constant 0 : index
    %7 = vector.load %arg8[%c0_5, %c0_6] : memref<1x32xf32, #tpu.memory_space<vmem>>, vector<1x32xf32>
    %8 = vector.broadcast %7 : vector<1x32xf32> to vector<8x32xf32>
    %9 = arith.mulf %6, %8 : vector<8x32xf32>
    %c31_i32 = arith.constant 31 : i32
    %10 = tpu.dynamic_rotate %5 by %c31_i32 dim 1 : vector<8x32xf32>, i32 -> vector<8x32xf32>
    %c0_7 = arith.constant 0 : index
    %c0_8 = arith.constant 0 : index
    %11 = vector.load %arg9[%c0_7, %c0_8] : memref<1x32xf32, #tpu.memory_space<vmem>>, vector<1x32xf32>
    %12 = vector.broadcast %11 : vector<1x32xf32> to vector<8x32xf32>
    %13 = arith.mulf %10, %12 : vector<8x32xf32>
    %c0_9 = arith.constant 0 : index
    %c0_10 = arith.constant 0 : index
    %14 = vector.load %arg4[%c0_9, %c0_10] : memref<8x3xf32, #tpu.memory_space<vmem>>, vector<8x1xf32>
    %15 = vector.broadcast %14 : vector<8x1xf32> to vector<8x32xf32>
    %16 = arith.mulf %15, %9 : vector<8x32xf32>
    %c0_11 = arith.constant 0 : index
    %c1 = arith.constant 1 : index
    %17 = vector.load %arg4[%c0_11, %c1] : memref<8x3xf32, #tpu.memory_space<vmem>>, vector<8x1xf32>
    %18 = vector.broadcast %17 : vector<8x1xf32> to vector<8x32xf32>
    %19 = arith.mulf %18, %5 : vector<8x32xf32>
    %20 = arith.addf %16, %19 : vector<8x32xf32>
    %c0_12 = arith.constant 0 : index
    %c2 = arith.constant 2 : index
    %21 = vector.load %arg4[%c0_12, %c2] : memref<8x3xf32, #tpu.memory_space<vmem>>, vector<8x1xf32>
    %22 = vector.broadcast %21 : vector<8x1xf32> to vector<8x32xf32>
    %23 = arith.mulf %22, %13 : vector<8x32xf32>
    %24 = arith.addf %20, %23 : vector<8x32xf32>
    %c0_13 = arith.constant 0 : index
    %c0_14 = arith.constant 0 : index
    %25 = vector.load %arg5[%c0_13, %c0_14] : memref<8x1xf32, #tpu.memory_space<vmem>>, vector<8x1xf32>
    %26 = vector.broadcast %25 : vector<8x1xf32> to vector<8x32xf32>
    %27 = arith.addf %24, %26 : vector<8x32xf32>
    %cst_15 = arith.constant 5.000000e-01 : f32
    %28 = vector.broadcast %cst_15 : f32 to vector<8x32xf32>
    %29 = arith.mulf %28, %27 : vector<8x32xf32>
    %cst_16 = arith.constant 0.707106769 : f32
    %30 = vector.broadcast %cst_16 : f32 to vector<8x32xf32>
    %31 = arith.mulf %27, %30 : vector<8x32xf32>
    %32 = math.erf %31 : vector<8x32xf32>
    %cst_17 = arith.constant 1.000000e+00 : f32
    %33 = vector.broadcast %cst_17 : f32 to vector<8x32xf32>
    %34 = arith.addf %33, %32 : vector<8x32xf32>
    %35 = arith.mulf %29, %34 : vector<8x32xf32>
    %c0_18 = arith.constant 0 : index
    %c0_19 = arith.constant 0 : index
    %36 = vector.load %arg6[%c0_18, %c0_19] : memref<4x8xf32, #tpu.memory_space<vmem>>, vector<4x8xf32>
    %cst_20 = arith.constant dense<0.000000e+00> : vector<4x32xf32>
    %37 = tpu.matmul %36, %35, %cst_20 {dimension_numbers = #tpu.dot_dimension_numbers<[1], [0], [0], [1], [0, 0, 1, 1], [], []>} : vector<4x8xf32>, vector<8x32xf32>, vector<4x32xf32> -> vector<4x32xf32>
    %c0_21 = arith.constant 0 : index
    %c0_22 = arith.constant 0 : index
    %38 = vector.load %arg7[%c0_21, %c0_22] : memref<4x1xf32, #tpu.memory_space<vmem>>, vector<4x1xf32>
    %39 = vector.broadcast %38 : vector<4x1xf32> to vector<4x32xf32>
    %40 = arith.addf %37, %39 : vector<4x32xf32>
    %c0_23 = arith.constant 0 : index
    %c0_24 = arith.constant 0 : index
    %41 = vector.load %arg10[%c0_23, %c0_24] : memref<4x32xf32, #tpu.memory_space<vmem>>, vector<4x32xf32>
    tpu.vector_store %arg10[%c0_23, %c0_24], %40 {strides = array<i32>} : memref<4x32xf32, #tpu.memory_space<vmem>>, vector<4x32xf32>,
    return
  }
  func.func @transform_0(%arg0: i32) -> (i32, i32) {
    %c0_i32 = arith.constant 0 : i32
    %c0_i32_0 = arith.constant 0 : i32
    return %c0_i32, %arg0 : i32, i32
  }
  func.func @transform_1(%arg0: i32) -> (i32, i32) {
    %c0_i32 = arith.constant 0 : i32
    %c0_i32_0 = arith.constant 0 : i32
    %c0_i32_1 = arith.constant 0 : i32
    return %c0_i32, %c0_i32_0 : i32, i32
  }
  func.func @transform_2(%arg0: i32) -> (i32, i32) {
    %c0_i32 = arith.constant 0 : i32
    %c0_i32_0 = arith.constant 0 : i32
    %c0_i32_1 = arith.constant 0 : i32
    return %c0_i32, %c0_i32_0 : i32, i32
  }
  func.func @transform_3(%arg0: i32) -> (i32, i32) {
    %c0_i32 = arith.constant 0 : i32
    %c0_i32_0 = arith.constant 0 : i32
    %c0_i32_1 = arith.constant 0 : i32
    return %c0_i32, %c0_i32_0 : i32, i32
  }
  func.func @transform_4(%arg0: i32) -> (i32, i32) {
    %c0_i32 = arith.constant 0 : i32
    %c0_i32_0 = arith.constant 0 : i32
    %c0_i32_1 = arith.constant 0 : i32
    return %c0_i32, %c0_i32_0 : i32, i32
  }
  func.func @transform_5(%arg0: i32) -> (i32, i32) {
    %c0_i32 = arith.constant 0 : i32
    %c0_i32_0 = arith.constant 0 : i32
    %c0_i32_1 = arith.constant 0 : i32
    return %c0_i32, %c0_i32_0 : i32, i32
  }
  func.func @transform_6(%arg0: i32) -> (i32, i32) {
    %c0_i32 = arith.constant 0 : i32
    %c0_i32_0 = arith.constant 0 : i32
    %c0_i32_1 = arith.constant 0 : i32
    return %c0_i32, %c0_i32_0 : i32, i32
  }
  func.func @transform_7(%arg0: i32) -> (i32, i32) {
    %c0_i32 = arith.constant 0 : i32
    %c0_i32_0 = arith.constant 0 : i32
    %c0_i32_1 = arith.constant 0 : i32
    return %c0_i32, %c0_i32_0 : i32, i32
  }
  func.func @transform_8(%arg0: i32) -> (i32, i32) {
    %c0_i32 = arith.constant 0 : i32
    %c0_i32_0 = arith.constant 0 : i32
    %c0_i32_1 = arith.constant 0 : i32
    return %c0_i32, %c0_i32_0 : i32, i32
  }
  func.func @transform_9(%arg0: i32) -> (i32, i32) {
    %c0_i32 = arith.constant 0 : i32
    %c0_i32_0 = arith.constant 0 : i32
    return %c0_i32, %arg0 : i32, i32
  }
}

module attributes {stable_mosaic.version = 11 : i64} {
  func.func @_mlp_kernel(%arg0: i32, %arg1: memref<4x32xf32, #tpu.memory_space<vmem>>, %arg2: memref<8x4xf32, #tpu.memory_space<vmem>>, %arg3: memref<8x1xf32, #tpu.memory_space<vmem>>, %arg4: memref<8x3xf32, #tpu.memory_space<vmem>>, %arg5: memref<8x1xf32, #tpu.memory_space<vmem>>, %arg6: memref<4x8xf32, #tpu.memory_space<vmem>>, %arg7: memref<4x1xf32, #tpu.memory_space<vmem>>, %arg8: memref<1x32xf32, #tpu.memory_space<vmem>>, %arg9: memref<1x32xf32, #tpu.memory_space<vmem>>, %arg10: memref<4x32xf32, #tpu.memory_space<vmem>>) attributes {dimension_semantics = [#tpu.dimension_semantics<parallel>], iteration_bounds = array<i64: 1>, scalar_prefetch = 0 : i64, scratch_operands = 0 : i64, tpu.core_type = #tpu.core_type<tc>, window_params = [{transform_indices = @transform_0, window_bounds = array<i64: 4, 32>}, {pipeline_mode = #tpu.pipeline_mode<synchronous>, transform_indices = @transform_1, window_bounds = array<i64: 8, 4>}, {pipeline_mode = #tpu.pipeline_mode<synchronous>, transform_indices = @transform_2, window_bounds = array<i64: 8, 1>}, {pipeline_mode = #tpu.pipeline_mode<synchronous>, transform_indices = @transform_3, window_bounds = array<i64: 8, 3>}, {pipeline_mode = #tpu.pipeline_mode<synchronous>, transform_indices = @transform_4, window_bounds = array<i64: 8, 1>}, {pipeline_mode = #tpu.pipeline_mode<synchronous>, transform_indices = @transform_5, window_bounds = array<i64: 4, 8>}, {pipeline_mode = #tpu.pipeline_mode<synchronous>, transform_indices = @transform_6, window_bounds = array<i64: 4, 1>}, {pipeline_mode = #tpu.pipeline_mode<synchronous>, transform_indices = @transform_7, window_bounds = array<i64: 1, 32>}, {pipeline_mode = #tpu.pipeline_mode<synchronous>, transform_indices = @transform_8, window_bounds = array<i64: 1, 32>}, {transform_indices = @transform_9, window_bounds = array<i64: 4, 32>}]} {
    %c0 = arith.constant 0 : index
    %c0_0 = arith.constant 0 : index
    %0 = vector.load %arg1[%c0, %c0_0] : memref<4x32xf32, #tpu.memory_space<vmem>>, vector<4x32xf32>
    %c0_1 = arith.constant 0 : index
    %c0_2 = arith.constant 0 : index
    %1 = vector.load %arg2[%c0_1, %c0_2] : memref<8x4xf32, #tpu.memory_space<vmem>>, vector<8x4xf32>
    %cst = arith.constant dense<0.000000e+00> : vector<8x32xf32>
    %2 = tpu.matmul %1, %0, %cst {dimension_numbers = #tpu.dot_dimension_numbers<[1], [0], [0], [1], [0, 0, 1, 1], [], []>} : vector<8x4xf32>, vector<4x32xf32>, vector<8x32xf32> -> vector<8x32xf32>
    %c0_3 = arith.constant 0 : index
    %c0_4 = arith.constant 0 : index
    %3 = vector.load %arg3[%c0_3, %c0_4] : memref<8x1xf32, #tpu.memory_space<vmem>>, vector<8x1xf32>
    %4 = vector.broadcast %3 : vector<8x1xf32> to vector<8x32xf32>
    %5 = arith.addf %2, %4 : vector<8x32xf32>
    %c1_i32 = arith.constant 1 : i32
    %6 = tpu.dynamic_rotate %5 by %c1_i32 dim 1 : vector<8x32xf32>, i32 -> vector<8x32xf32>
    %c0_5 = arith.constant 0 : index
    %c0_6 = arith.constant 0 : index
    %7 = vector.load %arg8[%c0_5, %c0_6] : memref<1x32xf32, #tpu.memory_space<vmem>>, vector<1x32xf32>
    %8 = vector.broadcast %7 : vector<1x32xf32> to vector<8x32xf32>
    %9 = arith.mulf %6, %8 : vector<8x32xf32>
    %c31_i32 = arith.constant 31 : i32
    %10 = tpu.dynamic_rotate %5 by %c31_i32 dim 1 : vector<8x32xf32>, i32 -> vector<8x32xf32>
    %c0_7 = arith.constant 0 : index
    %c0_8 = arith.constant 0 : index
    %11 = vector.load %arg9[%c0_7, %c0_8] : memref<1x32xf32, #tpu.memory_space<vmem>>, vector<1x32xf32>
    %12 = vector.broadcast %11 : vector<1x32xf32> to vector<8x32xf32>
    %13 = arith.mulf %10, %12 : vector<8x32xf32>
    %c0_9 = arith.constant 0 : index
    %c0_10 = arith.constant 0 : index
    %14 = vector.load %arg4[%c0_9, %c0_10] : memref<8x3xf32, #tpu.memory_space<vmem>>, vector<8x1xf32>
    %15 = vector.broadcast %14 : vector<8x1xf32> to vector<8x32xf32>
    %16 = arith.mulf %15, %9 : vector<8x32xf32>
    %c0_11 = arith.constant 0 : index
    %c1 = arith.constant 1 : index
    %17 = vector.load %arg4[%c0_11, %c1] : memref<8x3xf32, #tpu.memory_space<vmem>>, vector<8x1xf32>
    %18 = vector.broadcast %17 : vector<8x1xf32> to vector<8x32xf32>
    %19 = arith.mulf %18, %5 : vector<8x32xf32>
    %20 = arith.addf %16, %19 : vector<8x32xf32>
    %c0_12 = arith.constant 0 : index
    %c2 = arith.constant 2 : index
    %21 = vector.load %arg4[%c0_12, %c2] : memref<8x3xf32, #tpu.memory_space<vmem>>, vector<8x1xf32>
    %22 = vector.broadcast %21 : vector<8x1xf32> to vector<8x32xf32>
    %23 = arith.mulf %22, %13 : vector<8x32xf32>
    %24 = arith.addf %20, %23 : vector<8x32xf32>
    %c0_13 = arith.constant 0 : index
    %c0_14 = arith.constant 0 : index
    %25 = vector.load %arg5[%c0_13, %c0_14] : memref<8x1xf32, #tpu.memory_space<vmem>>, vector<8x1xf32>
    %26 = vector.broadcast %25 : vector<8x1xf32> to vector<8x32xf32>
    %27 = arith.addf %24, %26 : vector<8x32xf32>
    %cst_15 = arith.constant 5.000000e-01 : f32
    %28 = vector.broadcast %cst_15 : f32 to vector<8x32xf32>
    %29 = arith.mulf %28, %27 : vector<8x32xf32>
    %cst_16 = arith.constant 0.707106769 : f32
    %30 = vector.broadcast %cst_16 : f32 to vector<8x32xf32>
    %31 = arith.mulf %27, %30 : vector<8x32xf32>
    %32 = math.erf %31 : vector<8x32xf32>
    %cst_17 = arith.constant 1.000000e+00 : f32
    %33 = vector.broadcast %cst_17 : f32 to vector<8x32xf32>
    %34 = arith.addf %33, %32 : vector<8x32xf32>
    %35 = arith.mulf %29, %34 : vector<8x32xf32>
    %c0_18 = arith.constant 0 : index
    %c0_19 = arith.constant 0 : index
    %36 = vector.load %arg6[%c0_18, %c0_19] : memref<4x8xf32, #tpu.memory_space<vmem>>, vector<4x8xf32>
    %cst_20 = arith.constant dense<0.000000e+00> : vector<4x32xf32>
    %37 = tpu.matmul %36, %35, %cst_20 {dimension_numbers = #tpu.dot_dimension_numbers<[1], [0], [0], [1], [0, 0, 1, 1], [], []>} : vector<4x8xf32>, vector<8x32xf32>, vector<4x32xf32> -> vector<4x32xf32>
    %c0_21 = arith.constant 0 : index
    %c0_22 = arith.constant 0 : index
    %38 = vector.load %arg7[%c0_21, %c0_22] : memref<4x1xf32, #tpu.memory_space<vmem>>, vector<4x1xf32>
    %39 = vector.broadcast %38 : vector<4x1xf32> to vector<4x32xf32>
    %40 = arith.addf %37, %39 : vector<4x32xf32>
    %c0_23 = arith.constant 0 : index
    %c0_24 = arith.constant 0 : index
    %41 = vector.load %arg10[%c0_23, %c0_24] : memref<4x32xf32, #tpu.memory_space<vmem>>, vector<4x32xf32>
    tpu.vector_store %arg10[%c0_23, %c0_24], %40 {strides = array<i32>} : memref<4x32xf32, #tpu.memory_space<vmem>>, vector<4x32xf32>,
    return
  }
  func.func @transform_0(%arg0: i32) -> (i32, i32) {
    %c0_i32 = arith.constant 0 : i32
    %c0_i32_0 = arith.constant 0 : i32
    return %c0_i32, %arg0 : i32, i32
  }
  func.func @transform_1(%arg0: i32) -> (i32, i32) {
    %c0_i32 = arith.constant 0 : i32
    %c0_i32_0 = arith.constant 0 : i32
    %c0_i32_1 = arith.constant 0 : i32
    return %c0_i32, %c0_i32_0 : i32, i32
  }
  func.func @transform_2(%arg0: i32) -> (i32, i32) {
    %c0_i32 = arith.constant 0 : i32
    %c0_i32_0 = arith.constant 0 : i32
    %c0_i32_1 = arith.constant 0 : i32
    return %c0_i32, %c0_i32_0 : i32, i32
  }
  func.func @transform_3(%arg0: i32) -> (i32, i32) {
    %c0_i32 = arith.constant 0 : i32
    %c0_i32_0 = arith.constant 0 : i32
    %c0_i32_1 = arith.constant 0 : i32
    return %c0_i32, %c0_i32_0 : i32, i32
  }
  func.func @transform_4(%arg0: i32) -> (i32, i32) {
    %c0_i32 = arith.constant 0 : i32
    %c0_i32_0 = arith.constant 0 : i32
    %c0_i32_1 = arith.constant 0 : i32
    return %c0_i32, %c0_i32_0 : i32, i32
  }
  func.func @transform_5(%arg0: i32) -> (i32, i32) {
    %c0_i32 = arith.constant 0 : i32
    %c0_i32_0 = arith.constant 0 : i32
    %c0_i32_1 = arith.constant 0 : i32
    return %c0_i32, %c0_i32_0 : i32, i32
  }
  func.func @transform_6(%arg0: i32) -> (i32, i32) {
    %c0_i32 = arith.constant 0 : i32
    %c0_i32_0 = arith.constant 0 : i32
    %c0_i32_1 = arith.constant 0 : i32
    return %c0_i32, %c0_i32_0 : i32, i32
  }
  func.func @transform_7(%arg0: i32) -> (i32, i32) {
    %c0_i32 = arith.constant 0 : i32
    %c0_i32_0 = arith.constant 0 : i32
    %c0_i32_1 = arith.constant 0 : i32
    return %c0_i32, %c0_i32_0 : i32, i32
  }
  func.func @transform_8(%arg0: i32) -> (i32, i32) {
    %c0_i32 = arith.constant 0 : i32
    %c0_i32_0 = arith.constant 0 : i32
    %c0_i32_1 = arith.constant 0 : i32
    return %c0_i32, %c0_i32_0 : i32, i32
  }
  func.func @transform_9(%arg0: i32) -> (i32, i32) {
    %c0_i32 = arith.constant 0 : i32
    %c0_i32_0 = arith.constant 0 : i32
    return %c0_i32, %arg0 : i32, i32
  }
}

</mosaic_0001>

<bundles_post_ra>
// kernel: tpu_custom_call.1
= control target key start
LH: loop header
LB: loop body
LE: loop exit
PB: predicated region body
PF: predicated region fallthrough
CT: control target
= control target key end

     0   :  { %vm45_vm0 = vcmask 1043456   ;;  %v345_v2 = vmov 0.0   ;;  %vm346_vm1 = vmmov 0   ;;  %vm41_vm2 = vcmask 31744   ;;  %s445_s0 = inlined_call_operand.vmem [shape: f32[4,32], index: 0, kind: input, shape index: {}]   ;;  %s446_s1 = inlined_call_operand.vmem [shape: f32[8,4], index: 1, kind: input, shape index: {}]   ;;  %s447_s2 = inlined_call_operand.vmem [shape: f32[8,1], index: 2, kind: input, shape index: {}]   ;;  %s448_s3 = inlined_call_operand.vmem [shape: f32[8,3], index: 3, kind: input, shape index: {}]   ;;  %s449_s4 = inlined_call_operand.vmem [shape: f32[8,1], index: 4, kind: input, shape index: {}]   ;;  %s450_s5 = inlined_call_operand.vmem [shape: f32[4,8], index: 5, kind: input, shape index: {}]   ;;  %s451_s6 = inlined_call_operand.vmem [shape: f32[4,1], index: 6, kind: input, shape index: {}]   ;;  %s452_s7 = inlined_call_operand.vmem [shape: f32[1,32], index: 7, kind: input, shape index: {}]   ;;  %s453_s8 = inlined_call_operand.vmem [shape: f32[1,32], index: 8, kind: input, shape index: {}]   ;;  %s454_s9 = inlined_call_operand.hbm [shape: f32[4,32], index: 9, kind: output, shape index: {}]  }
   0x1   :  { %v33_v0 = vld [vmem:[%s445_s0] sm:$0xf]  ;;  %295 = vmatprep.subr.mxu0 %v345_v2  ;;  %297 = vmatprep.mubr.msk.f32.mxu0 %vm346_vm1, %v345_v2  ;;  %v347_v4 = vmov 0  }
   0x2   :  { %v34_v1 = vld [vmem:[%s446_s1] sm:$0xff]  ;;  %296 = vmatpush3.msk.msra.mxu0 %vm45_vm0, %v33_v0  ;;  %316 = vset.pattern.permute.xlu0 %v347_v4 }
   0x3   :  { %v35_v3 = vld [vmem:[%s447_s2] sm:$0xff] }
   0x4   :  { %v146_v5 = vld [vmem:[%s448_s3] sm:$0xff] }
   0x5   :  { %14 = vsyncpa [#allocation3], 0  ;;  %298 = vmatmul.mubr.msk.f32.vlgmr.msra.gmra.mrb[0].mxu0 %vm41_vm2, %v34_v1  ;;  %38 = vperm.xlu0 %316, %v35_v3   ;;  %v348_v6 = vmov 1   ;;  %v349_v7 = vmov 2   ;;  %v289_v8 = vld [vmem:[%s453_s8] ss:$0 sm:$0xff] }
   0x6   :  { %317 = vset.pattern.permute.xlu1 %v348_v6  ;;  %300 = vmatprep.subr.mxu1 %v345_v2  ;;  %s350_s2 = smov 1   ;;  %v288_v9 = vld [vmem:[%s452_s7] ss:$0 sm:$0xff]  ;;  %s351_s3 = smov 31   ;;  %vm119_vm3 = vcmask 1047808   ;;  %vm196_vm4 = vcmask 64512  }
   0x7   :  { %154 = vperm.xlu1 %317, %v146_v5   ;;  %302 = vmatprep.mubr.msk.f32.mxu1 %vm346_vm1, %v345_v2  ;;  %s352_s19 = smov 32   ;;  %v173_v18 = vld [vmem:[%s449_s4] sm:$0xff]  ;;  %s353_s7 = smov 30   ;;  %vm270_vm5 = vcmask 257024  }
   0x8   :  { %v186_v25 = vld [vmem:[%s451_s6] sm:$0xf]  ;;  %s354_s4 = smov 97   ;;  %s355_s24 = smov [#allocation2]  }
   0x9   :  { %v185_v41 = vld [vmem:[%s450_s5] sm:$0xf]  ;;  %s278_s25 = sshll.u32 %s355_s24, 4  ;;  %s279_s25 = int_to_ptr.vmem [resolvable:$true] %s278_s25 }
   0xa   :  { %s321_s26 = scalar_lea.vmem %s279_s25, 64  ;;  %p326_p1 = scmp.lt.s32.totalorder %s279_s25, %s279_s25 }
   0xb   :  { %318 = vset.pattern.permute.xlu1 %v349_v7  ;;  %p322_p0 = scmp.ne.s32.totalorder %s279_s25, %s321_s26  ;;  %p327_p2 = scmp.lt.s32.totalorder %s321_s26, %s321_s26 }
   0xc   :  { %164 = vperm.xlu1 %318, %v146_v5  }
   0xd   :  { %p328_p3 = por %p327_p2, %p326_p1 }
   0xf   :  { %p329_p4 = pnand %p328_p3, %p322_p0 }
  0x10   :  { %142 = vrot.lane.b32.xlu1 %v289_v8, %s350_s2 }
  0x14   :  { %132 = vrot.lane.b32.xlu1 %v288_v9, %s351_s3 }
  0x84   :  { %v39_v10 = vpop.permute.xlu0 %38 }
  0x86   :  { %v155_v12 = vpop.permute.xlu1 %154 }
  0x8b   :  { %v165_v19 = vpop.permute.xlu1 %164 }
  0x8f   :  { %v143_v21 = vpop.permute.xlu1 %142 }
  0x93   :  { %v133_v27 = vpop.permute.xlu1 %132 }
  0xd8   :  { %v115_v11 = vpop.f32.mrb[0].mxu0 }
  0xd9   :  { %v116_v13 = vadd.f32 %v115_v11, %v39_v10  ;;  %v299_v14 = vpop.f32.mrb[1].mxu0 }
  0xdb   :  { %v157_v15 = vmul.f32 %v155_v12, %v116_v13  ;;  %120 = vrot.lane.b32.xlu0 %v116_v13, %s352_s19 }
  0xdd   :  { %159 = vrot.lane.b32.xlu1 %v157_v15, %s351_s3 }
 0x14d   :  { %v121_v16 = vpop.permute.xlu0 %120 }
 0x14e   :  { %v122_v17 = vsel %vm119_vm3, %v121_v16, %v116_v13 }
 0x14f   :  { %123 = vrot.lane.b32.xlu0 %v122_v17, %s352_s19  ;;  %v160_v31 = vpop.permute.xlu1 %159 }
 0x153   :  { %149 = vperm.xlu0 %316, %v146_v5  }
 0x157   :  { %176 = vperm.xlu0 %316, %v173_v18  }
 0x1c1   :  { %v124_v20 = vpop.permute.xlu0 %123 }
 0x1c2   :  { %v125_v22 = vsel %vm119_vm3, %v124_v20, %v116_v13 }
 0x1c3   :  { %v145_v23 = vmul.f32 %v143_v21, %v125_v22  ;;  %v135_v28 = vmul.f32 %v133_v27, %v125_v22 }
 0x1c5   :  { %v167_v24 = vmul.f32 %v165_v19, %v145_v23 }
 0x1c7   :  { %169 = vrot.lane.b32.xlu0 %v167_v24, %s353_s7 }
 0x1cb   :  { %189 = vperm.xlu0 %316, %v186_v25  }
 0x1d2   :  { %v150_v26 = vpop.permute.xlu0 %149 }
 0x1d3   :  { %v152_v29 = vmul.f32 %v150_v26, %v135_v28 }
 0x1d5   :  { %v162_v32 = vadd.f32 %v160_v31, %v152_v29 }
 0x1d6   :  { %v177_v30 = vpop.permute.xlu0 %176 }
 0x239   :  { %v170_v33 = vpop.permute.xlu0 %169 }
 0x23a   :  { %v172_v34 = vadd.f32 %v170_v33, %v162_v32 }
 0x23c   :  { %v179_v35 = vadd.f32 %v177_v30, %v172_v34 }
 0x23e   :  { %v181_v36 = vmul.f32 0.70710677, %v179_v35  ;;  %v180_v38 = vmul.f32 0.5, %v179_v35 }
 0x240   :  { %319 = verf.f32 %v181_v36 }
 0x24a   :  { %v320_v37 = vpop.eup %319  ;;  %v190_v43 = vpop.permute.xlu0 %189 }
 0x24b   :  { %v183_v39 = vadd.f32 1.0, %v320_v37 }
 0x24d   :  { %v184_v40 = vmul.f32 %v183_v39, %v180_v38 }
 0x24f   :  { %193 = vrot.lane.b32.xlu1 %v184_v40, %s354_s4 }
 0x2c1   :  { %v194_v42 = vpop.permute.xlu1 %193 }
 0x2c2   :  { %301 = vmatpush3.msra.mxu1 %v194_v42 }
 0x2c3   :  { %303 = vmatmul.mubr.msk.f32.vlgmr.msra.gmra.mrb[0].mxu1 %vm196_vm4, %v185_v41 }
 0x396   :  { %v266_v44 = vpop.f32.mrb[0].mxu1 }
 0x397   :  { %v267_v45 = vadd.f32 %v266_v44, %v190_v43  ;;  %v304_v46 = vpop.f32.mrb[1].mxu1 }
 0x399   :  { %271 = vst.msk [vmem:[#allocation2] sm:$0xf] %vm270_vm5, %v267_v45 }
 0x39a   :  { %332 = shalt.err (!%p329_p4)
}
 0x39b   :  { %s333_s28 = scalar_lea.hbm %s454_s9, 64 }
 0x39c   :  { %p334_p5 = scmp.ne.s32.totalorder %s454_s9, %s333_s28  ;;  %p337_p6 = scmp.lt.u32.totalorder %s333_s28, %s454_s9 }
 0x39e   :  { %p339_p7 = pnand %p337_p6, %p334_p5 }
 0x3a0   :  { %342 = shalt.err (!%p339_p7)
}
 0x3a1   :  { %281 = dma.vmem_to_hbm [thread:$0]  %s279_s25, 64, %s454_s9, [#allocation3]  }
 0x3a2   :  { %343 = dma.done.wait [#allocation3], 64  }
 0x3a3   :  { %344 = vsyncadd [#allocation3], 4294967232 }
 0x3a4   :  { %285 = vsyncpa [#allocation3], 1 }

// kernel: tpu_custom_call.1
= control target key start
LH: loop header
LB: loop body
LE: loop exit
PB: predicated region body
PF: predicated region fallthrough
CT: control target
= control target key end

     0   :  { %vm45_vm0 = vcmask 1043456   ;;  %v345_v2 = vmov 0.0   ;;  %vm346_vm1 = vmmov 0   ;;  %vm41_vm2 = vcmask 31744   ;;  %s445_s0 = inlined_call_operand.vmem [shape: f32[4,32], index: 0, kind: input, shape index: {}]   ;;  %s446_s1 = inlined_call_operand.vmem [shape: f32[8,4], index: 1, kind: input, shape index: {}]   ;;  %s447_s2 = inlined_call_operand.vmem [shape: f32[8,1], index: 2, kind: input, shape index: {}]   ;;  %s448_s3 = inlined_call_operand.vmem [shape: f32[8,3], index: 3, kind: input, shape index: {}]   ;;  %s449_s4 = inlined_call_operand.vmem [shape: f32[8,1], index: 4, kind: input, shape index: {}]   ;;  %s450_s5 = inlined_call_operand.vmem [shape: f32[4,8], index: 5, kind: input, shape index: {}]   ;;  %s451_s6 = inlined_call_operand.vmem [shape: f32[4,1], index: 6, kind: input, shape index: {}]   ;;  %s452_s7 = inlined_call_operand.vmem [shape: f32[1,32], index: 7, kind: input, shape index: {}]   ;;  %s453_s8 = inlined_call_operand.vmem [shape: f32[1,32], index: 8, kind: input, shape index: {}]   ;;  %s454_s9 = inlined_call_operand.hbm [shape: f32[4,32], index: 9, kind: output, shape index: {}]  }
   0x1   :  { %v33_v0 = vld [vmem:[%s445_s0] sm:$0xf]  ;;  %295 = vmatprep.subr.mxu0 %v345_v2  ;;  %297 = vmatprep.mubr.msk.f32.mxu0 %vm346_vm1, %v345_v2  ;;  %v347_v4 = vmov 0  }
   0x2   :  { %v34_v1 = vld [vmem:[%s446_s1] sm:$0xff]  ;;  %296 = vmatpush3.msk.msra.mxu0 %vm45_vm0, %v33_v0  ;;  %316 = vset.pattern.permute.xlu0 %v347_v4 }
   0x3   :  { %v35_v3 = vld [vmem:[%s447_s2] sm:$0xff] }
   0x4   :  { %v146_v5 = vld [vmem:[%s448_s3] sm:$0xff] }
   0x5   :  { %14 = vsyncpa [#allocation3], 0  ;;  %298 = vmatmul.mubr.msk.f32.vlgmr.msra.gmra.mrb[0].mxu0 %vm41_vm2, %v34_v1  ;;  %38 = vperm.xlu0 %316, %v35_v3   ;;  %v348_v6 = vmov 1   ;;  %v349_v7 = vmov 2   ;;  %v289_v8 = vld [vmem:[%s453_s8] ss:$0 sm:$0xff] }
   0x6   :  { %317 = vset.pattern.permute.xlu1 %v348_v6  ;;  %300 = vmatprep.subr.mxu1 %v345_v2  ;;  %s350_s2 = smov 1   ;;  %v288_v9 = vld [vmem:[%s452_s7] ss:$0 sm:$0xff]  ;;  %s351_s3 = smov 31   ;;  %vm119_vm3 = vcmask 1047808   ;;  %vm196_vm4 = vcmask 64512  }
   0x7   :  { %154 = vperm.xlu1 %317, %v146_v5   ;;  %302 = vmatprep.mubr.msk.f32.mxu1 %vm346_vm1, %v345_v2  ;;  %s352_s19 = smov 32   ;;  %v173_v18 = vld [vmem:[%s449_s4] sm:$0xff]  ;;  %s353_s7 = smov 30   ;;  %vm270_vm5 = vcmask 257024  }
   0x8   :  { %v186_v25 = vld [vmem:[%s451_s6] sm:$0xf]  ;;  %s354_s4 = smov 97   ;;  %s355_s24 = smov [#allocation2]  }
   0x9   :  { %v185_v41 = vld [vmem:[%s450_s5] sm:$0xf]  ;;  %s278_s25 = sshll.u32 %s355_s24, 4  ;;  %s279_s25 = int_to_ptr.vmem [resolvable:$true] %s278_s25 }
   0xa   :  { %s321_s26 = scalar_lea.vmem %s279_s25, 64  ;;  %p326_p1 = scmp.lt.s32.totalorder %s279_s25, %s279_s25 }
   0xb   :  { %318 = vset.pattern.permute.xlu1 %v349_v7  ;;  %p322_p0 = scmp.ne.s32.totalorder %s279_s25, %s321_s26  ;;  %p327_p2 = scmp.lt.s32.totalorder %s321_s26, %s321_s26 }
   0xc   :  { %164 = vperm.xlu1 %318, %v146_v5  }
   0xd   :  { %p328_p3 = por %p327_p2, %p326_p1 }
   0xf   :  { %p329_p4 = pnand %p328_p3, %p322_p0 }
  0x10   :  { %142 = vrot.lane.b32.xlu1 %v289_v8, %s350_s2 }
  0x14   :  { %132 = vrot.lane.b32.xlu1 %v288_v9, %s351_s3 }
  0x84   :  { %v39_v10 = vpop.permute.xlu0 %38 }
  0x86   :  { %v155_v12 = vpop.permute.xlu1 %154 }
  0x8b   :  { %v165_v19 = vpop.permute.xlu1 %164 }
  0x8f   :  { %v143_v21 = vpop.permute.xlu1 %142 }
  0x93   :  { %v133_v27 = vpop.permute.xlu1 %132 }
  0xd8   :  { %v115_v11 = vpop.f32.mrb[0].mxu0 }
  0xd9   :  { %v116_v13 = vadd.f32 %v115_v11, %v39_v10  ;;  %v299_v14 = vpop.f32.mrb[1].mxu0 }
  0xdb   :  { %v157_v15 = vmul.f32 %v155_v12, %v116_v13  ;;  %120 = vrot.lane.b32.xlu0 %v116_v13, %s352_s19 }
  0xdd   :  { %159 = vrot.lane.b32.xlu1 %v157_v15, %s351_s3 }
 0x14d   :  { %v121_v16 = vpop.permute.xlu0 %120 }
 0x14e   :  { %v122_v17 = vsel %vm119_vm3, %v121_v16, %v116_v13 }
 0x14f   :  { %123 = vrot.lane.b32.xlu0 %v122_v17, %s352_s19  ;;  %v160_v31 = vpop.permute.xlu1 %159 }
 0x153   :  { %149 = vperm.xlu0 %316, %v146_v5  }
 0x157   :  { %176 = vperm.xlu0 %316, %v173_v18  }
 0x1c1   :  { %v124_v20 = vpop.permute.xlu0 %123 }
 0x1c2   :  { %v125_v22 = vsel %vm119_vm3, %v124_v20, %v116_v13 }
 0x1c3   :  { %v145_v23 = vmul.f32 %v143_v21, %v125_v22  ;;  %v135_v28 = vmul.f32 %v133_v27, %v125_v22 }
 0x1c5   :  { %v167_v24 = vmul.f32 %v165_v19, %v145_v23 }
 0x1c7   :  { %169 = vrot.lane.b32.xlu0 %v167_v24, %s353_s7 }
 0x1cb   :  { %189 = vperm.xlu0 %316, %v186_v25  }
 0x1d2   :  { %v150_v26 = vpop.permute.xlu0 %149 }
 0x1d3   :  { %v152_v29 = vmul.f32 %v150_v26, %v135_v28 }
 0x1d5   :  { %v162_v32 = vadd.f32 %v160_v31, %v152_v29 }
 0x1d6   :  { %v177_v30 = vpop.permute.xlu0 %176 }
 0x239   :  { %v170_v33 = vpop.permute.xlu0 %169 }
 0x23a   :  { %v172_v34 = vadd.f32 %v170_v33, %v162_v32 }
 0x23c   :  { %v179_v35 = vadd.f32 %v177_v30, %v172_v34 }
 0x23e   :  { %v181_v36 = vmul.f32 0.70710677, %v179_v35  ;;  %v180_v38 = vmul.f32 0.5, %v179_v35 }
 0x240   :  { %319 = verf.f32 %v181_v36 }
 0x24a   :  { %v320_v37 = vpop.eup %319  ;;  %v190_v43 = vpop.permute.xlu0 %189 }
 0x24b   :  { %v183_v39 = vadd.f32 1.0, %v320_v37 }
 0x24d   :  { %v184_v40 = vmul.f32 %v183_v39, %v180_v38 }
 0x24f   :  { %193 = vrot.lane.b32.xlu1 %v184_v40, %s354_s4 }
 0x2c1   :  { %v194_v42 = vpop.permute.xlu1 %193 }
 0x2c2   :  { %301 = vmatpush3.msra.mxu1 %v194_v42 }
 0x2c3   :  { %303 = vmatmul.mubr.msk.f32.vlgmr.msra.gmra.mrb[0].mxu1 %vm196_vm4, %v185_v41 }
 0x396   :  { %v266_v44 = vpop.f32.mrb[0].mxu1 }
 0x397   :  { %v267_v45 = vadd.f32 %v266_v44, %v190_v43  ;;  %v304_v46 = vpop.f32.mrb[1].mxu1 }
 0x399   :  { %271 = vst.msk [vmem:[#allocation2] sm:$0xf] %vm270_vm5, %v267_v45 }
 0x39a   :  { %332 = shalt.err (!%p329_p4)
}
 0x39b   :  { %s333_s28 = scalar_lea.hbm %s454_s9, 64 }
 0x39c   :  { %p334_p5 = scmp.ne.s32.totalorder %s454_s9, %s333_s28  ;;  %p337_p6 = scmp.lt.u32.totalorder %s333_s28, %s454_s9 }
 0x39e   :  { %p339_p7 = pnand %p337_p6, %p334_p5 }
 0x3a0   :  { %342 = shalt.err (!%p339_p7)
}
 0x3a1   :  { %281 = dma.vmem_to_hbm [thread:$0]  %s279_s25, 64, %s454_s9, [#allocation3]  }
 0x3a2   :  { %343 = dma.done.wait [#allocation3], 64  }
 0x3a3   :  { %344 = vsyncadd [#allocation3], 4294967232 }
 0x3a4   :  { %285 = vsyncpa [#allocation3], 1 }

</bundles_post_ra>
